<compile_context>
chip_gen: v5e
topology: v5e:2x2
jax: 0.10.0
libtpu: 0.0.40
codegen_flags: <defaults>
</compile_context>

<pallas_src>
import functools
import math

import jax
import jax.numpy as jnp
from jax import lax
from jax.experimental import pallas as pl
from jax.experimental.pallas import tpu as pltpu

# -1 * log(1e-4): constant factor of the closed-form reverse cross entropy.
_NEG_LOG_1E4 = -math.log(1e-4)

# 10 * 16384 * 4B = 640 KiB per pred tile (x2 double-buffer) -> comfortably
# under the scoped-VMEM limit on v5e / v6e / v7x while amortizing the
# ~0.35 us per-grid-step overhead.
_DEFAULT_TILE_N = 16384


def _sce_kernel(pred_ref, labels_ref, out_ref, *, n_total, tile_n):
    """One batch tile. pred_ref: (C, TN), labels_ref: (1, TN) i32, out_ref: (1, 128)."""
    pred = pred_ref[...].astype(jnp.float32)       # upcast after load (bf16 ok)
    labels = labels_ref[...]                        # (1, TN) int32
    c, tn = pred.shape

    # one-hot along the class (sublane) axis via iota compare.
    row_ids = lax.broadcasted_iota(jnp.int32, (c, tn), 0)
    onehot = row_ids == labels                      # (C, TN) bool

    # --- softmax stats: single exp pass over the (C, TN) tile ---
    m = jnp.max(pred, axis=0, keepdims=True)        # (1, TN)
    z = pred - m
    ez = jnp.exp(z)                                 # the only N*C transcendental pass
    s = jnp.sum(ez, axis=0, keepdims=True)          # (1, TN)
    inv_s = pl.reciprocal(s, approx=False)          # exact; only a (1, TN) row

    # --- cross entropy: lse - logit[label] = log(s) - z[label] ---
    z_label = jnp.sum(jnp.where(onehot, z, 0.0), axis=0, keepdims=True)
    ce_i = jnp.log(s) - z_label                     # (1, TN)

    # --- reverse cross entropy, closed form ---
    p = jnp.clip(ez * inv_s, 1e-7, 1.0)             # clamped softmax (C, TN)
    sum_p = jnp.sum(p, axis=0, keepdims=True)
    p_label = jnp.sum(jnp.where(onehot, p, 0.0), axis=0, keepdims=True)
    rce_i = _NEG_LOG_1E4 * (sum_p - p_label)        # (1, TN)

    # Mask columns past the true batch size (only if the last tile overhangs).
    if n_total % tile_n != 0:
        col = pl.program_id(0) * tile_n + lax.broadcasted_iota(jnp.int32, (1, tn), 1)
        valid = col < n_total
        ce_i = jnp.where(valid, ce_i, 0.0)
        rce_i = jnp.where(valid, rce_i, 0.0)

    ce_sum = jnp.sum(ce_i)
    rce_sum = jnp.sum(rce_i)

    # Lane-dense (1, 128) partials row: lane 0 = CE partial, lane 1 = RCE partial.
    lane = lax.broadcasted_iota(jnp.int32, (1, 128), 1)
    out_ref[...] = (jnp.where(lane == 0, ce_sum, 0.0)
                    + jnp.where(lane == 1, rce_sum, 0.0))


def sce_loss(pred, labels, alpha=0.1, beta=1.0, num_classes=10, tile_n=None):
    """pred: (N, num_classes) logits (f32 or bf16); labels: (N,) ints. Returns f32 scalar."""
    n, c = pred.shape
    assert c == num_classes

    # Class-major view: batch -> lanes, classes -> sublanes.
    # TODO(synk): if the producer can emit class-major logits directly, drop this
    # transpose and save one HBM pass.
    pred_cm = pred.T                                # (C, N); keeps the input dtype
    labels2d = labels.astype(jnp.int32).reshape(1, n)

    if tile_n is None:
        tile_n = _DEFAULT_TILE_N
    if tile_n >= n:
        tile_n = n                                  # single full-array block
    else:
        assert tile_n % 128 == 0, "tile_n must be a multiple of 128"
    num_tiles = -(-n // tile_n)

    kernel = functools.partial(_sce_kernel, n_total=n, tile_n=tile_n)

    cost = pl.CostEstimate(
        flops=10 * n * c,
        transcendentals=n * c + 2 * n,
        bytes_accessed=n * c * pred.dtype.itemsize + n * 4 + num_tiles * 128 * 4,
    )

    partials = pl.pallas_call(
        kernel,
        out_shape=jax.ShapeDtypeStruct((num_tiles, 128), jnp.float32),
        grid=(num_tiles,),
        in_specs=[
            pl.BlockSpec((c, tile_n), lambda i: (0, i)),
            pl.BlockSpec((1, tile_n), lambda i: (0, i)),
        ],
        out_specs=pl.BlockSpec((1, 128), lambda i: (i, 0)),
        compiler_params=pltpu.CompilerParams(
            dimension_semantics=("parallel",),      # tiles independent; megacore on v7x
            vmem_limit_bytes=32 * 1024 * 1024,
        ),
        cost_estimate=cost,
    )(pred_cm, labels2d)

    inv_n = jnp.float32(1.0 / n)                    # multiply by precomputed 1/n
    ce = jnp.sum(partials[:, 0]) * inv_n
    rce = jnp.sum(partials[:, 1]) * inv_n
    return jnp.float32(alpha) * ce + jnp.float32(beta) * rce


def _sce_loss_ref(pred, labels, alpha, beta, num_classes):
    # Pure-JAX reference matching the PyTorch module.
    predf = pred.astype(jnp.float32)
    logp = jax.nn.log_softmax(predf, axis=1)
    onehot = jax.nn.one_hot(labels, num_classes, dtype=jnp.float32)
    ce = jnp.mean(-jnp.sum(onehot * logp, axis=1))
    p = jnp.clip(jax.nn.softmax(predf, axis=1), 1e-7, 1.0)
    label_clamped = jnp.clip(onehot, 1e-4, 1.0)
    rce = -jnp.sum(p * jnp.log(label_clamped), axis=1)
    return alpha * ce + beta * jnp.mean(rce)


if __name__ == "__main__":
    key = jax.random.PRNGKey(0)
    kp1, kl1, kp2, kl2 = jax.random.split(key, 4)

    alpha, beta, C = 0.1, 1.0, 10

    # Case 1: small batch -> single full-array block.
    N1 = 8
    pred1 = jax.random.normal(kp1, (N1, C), dtype=jnp.float32) * 2.0
    labels1 = jax.random.randint(kl1, (N1,), 0, C, dtype=jnp.int32)
    loss1 = jax.block_until_ready(sce_loss(pred1, labels1, alpha, beta, C))
    ref1 = _sce_loss_ref(pred1, labels1, alpha, beta, C)
    assert jnp.allclose(loss1, ref1, rtol=1e-5, atol=1e-5), (loss1, ref1)

    # Case 2: multi-tile grid with a partial last tile (exercises masking + accumulation).
    N2 = 300
    pred2 = jax.random.normal(kp2, (N2, C), dtype=jnp.float32) * 3.0
    labels2 = jax.random.randint(kl2, (N2,), 0, C, dtype=jnp.int32)
    loss2 = jax.block_until_ready(sce_loss(pred2, labels2, alpha, beta, C, tile_n=128))
    ref2 = _sce_loss_ref(pred2, labels2, alpha, beta, C)
    assert jnp.allclose(loss2, ref2, rtol=1e-5, atol=1e-5), (loss2, ref2)

    print("KERNEL_OK")
</pallas_src>

<mosaic_0001>
module attributes {stable_mosaic.version = 11 : i64} {
  func.func @_sce_kernel(%arg0: i32, %arg1: memref<10x8xf32, #tpu.memory_space<vmem>>, %arg2: memref<1x8xi32, #tpu.memory_space<vmem>>, %arg3: memref<1x128xf32, #tpu.memory_space<vmem>>) attributes {dimension_semantics = [#tpu.dimension_semantics<parallel>], iteration_bounds = array<i64: 1>, scalar_prefetch = 0 : i64, scratch_operands = 0 : i64, tpu.core_type = #tpu.core_type<tc>, window_params = [{transform_indices = @transform_0, window_bounds = array<i64: 10, 8>}, {transform_indices = @transform_1, window_bounds = array<i64: 1, 8>}, {transform_indices = @transform_2, window_bounds = array<i64: 1, 128>}]} {
    %c0 = arith.constant 0 : index
    %c0_0 = arith.constant 0 : index
    %0 = vector.load %arg1[%c0, %c0_0] : memref<10x8xf32, #tpu.memory_space<vmem>>, vector<10x8xf32>
    %c0_1 = arith.constant 0 : index
    %c0_2 = arith.constant 0 : index
    %1 = vector.load %arg2[%c0_1, %c0_2] : memref<1x8xi32, #tpu.memory_space<vmem>>, vector<1x8xi32>
    %2 = tpu.iota {dimensions = array<i32: 0>} : vector<10x8xi32>
    %3 = vector.broadcast %1 : vector<1x8xi32> to vector<10x8xi32>
    %4 = arith.cmpi eq, %2, %3 : vector<10x8xi32>
    %cst = arith.constant dense<0xFF800000> : vector<8xf32>
    %5 = vector.multi_reduction <maximumf>, %0, %cst [0] : vector<10x8xf32> to vector<8xf32>
    %6 = vector.shape_cast %5 : vector<8xf32> to vector<1x8xf32>
    %7 = vector.broadcast %6 : vector<1x8xf32> to vector<10x8xf32>
    %8 = arith.subf %0, %7 : vector<10x8xf32>
    %9 = math.exp %8 : vector<10x8xf32>
    %cst_3 = arith.constant dense<0.000000e+00> : vector<8xf32>
    %10 = vector.multi_reduction <add>, %9, %cst_3 [0] : vector<10x8xf32> to vector<8xf32>
    %11 = vector.shape_cast %10 : vector<8xf32> to vector<1x8xf32>
    %12 = tpu.reciprocal %11 : vector<1x8xf32> -> vector<1x8xf32>
    %cst_4 = arith.constant 0.000000e+00 : f32
    %13 = vector.broadcast %cst_4 : f32 to vector<10x8xf32>
    %14 = arith.select %4, %8, %13 : vector<10x8xi1>, vector<10x8xf32>
    %cst_5 = arith.constant dense<0.000000e+00> : vector<8xf32>
    %15 = vector.multi_reduction <add>, %14, %cst_5 [0] : vector<10x8xf32> to vector<8xf32>
    %16 = vector.shape_cast %15 : vector<8xf32> to vector<1x8xf32>
    %17 = math.log %11 : vector<1x8xf32>
    %18 = arith.subf %17, %16 : vector<1x8xf32>
    %19 = vector.broadcast %12 : vector<1x8xf32> to vector<10x8xf32>
    %20 = arith.mulf %9, %19 : vector<10x8xf32>
    %cst_6 = arith.constant 1.000000e-07 : f32
    %cst_7 = arith.constant 1.000000e+00 : f32
    %21 = vector.broadcast %cst_6 : f32 to vector<10x8xf32>
    %22 = arith.maximumf %21, %20 : vector<10x8xf32>
    %23 = vector.broadcast %cst_7 : f32 to vector<10x8xf32>
    %24 = arith.minimumf %23, %22 : vector<10x8xf32>
    %cst_8 = arith.constant dense<0.000000e+00> : vector<8xf32>
    %25 = vector.multi_reduction <add>, %24, %cst_8 [0] : vector<10x8xf32> to vector<8xf32>
    %26 = vector.shape_cast %25 : vector<8xf32> to vector<1x8xf32>
    %cst_9 = arith.constant 0.000000e+00 : f32
    %27 = vector.broadcast %cst_9 : f32 to vector<10x8xf32>
    %28 = arith.select %4, %24, %27 : vector<10x8xi1>, vector<10x8xf32>
    %cst_10 = arith.constant dense<0.000000e+00> : vector<8xf32>
    %29 = vector.multi_reduction <add>, %28, %cst_10 [0] : vector<10x8xf32> to vector<8xf32>
    %30 = vector.shape_cast %29 : vector<8xf32> to vector<1x8xf32>
    %31 = arith.subf %26, %30 : vector<1x8xf32>
    %cst_11 = arith.constant 9.21034049 : f32
    %32 = vector.broadcast %cst_11 : f32 to vector<1x8xf32>
    %33 = arith.mulf %32, %31 : vector<1x8xf32>
    %34 = vector.shape_cast %18 : vector<1x8xf32> to vector<1x1x8xf32>
    %cst_12 = arith.constant dense<0.000000e+00> : vector<1xf32>
    %35 = vector.multi_reduction <add>, %34, %cst_12 [1, 2] : vector<1x1x8xf32> to vector<1xf32>
    %36 = vector.shape_cast %35 : vector<1xf32> to vector<1x1x1xf32>
    %37 = vector.extract %36[0, 0, 0] : f32 from vector<1x1x1xf32>
    %38 = vector.shape_cast %33 : vector<1x8xf32> to vector<1x1x8xf32>
    %cst_13 = arith.constant dense<0.000000e+00> : vector<1xf32>
    %39 = vector.multi_reduction <add>, %38, %cst_13 [1, 2] : vector<1x1x8xf32> to vector<1xf32>
    %40 = vector.shape_cast %39 : vector<1xf32> to vector<1x1x1xf32>
    %41 = vector.extract %40[0, 0, 0] : f32 from vector<1x1x1xf32>
    %42 = tpu.iota {dimensions = array<i32: 1>} : vector<1x128xi32>
    %c0_i32 = arith.constant 0 : i32
    %43 = vector.broadcast %c0_i32 : i32 to vector<1x128xi32>
    %44 = arith.cmpi eq, %42, %43 : vector<1x128xi32>
    %cst_14 = arith.constant 0.000000e+00 : f32
    %45 = vector.broadcast %37 : f32 to vector<1x128xf32>
    %46 = vector.broadcast %cst_14 : f32 to vector<1x128xf32>
    %47 = arith.select %44, %45, %46 : vector<1x128xi1>, vector<1x128xf32>
    %c1_i32 = arith.constant 1 : i32
    %48 = vector.broadcast %c1_i32 : i32 to vector<1x128xi32>
    %49 = arith.cmpi eq, %42, %48 : vector<1x128xi32>
    %cst_15 = arith.constant 0.000000e+00 : f32
    %50 = vector.broadcast %41 : f32 to vector<1x128xf32>
    %51 = vector.broadcast %cst_15 : f32 to vector<1x128xf32>
    %52 = arith.select %49, %50, %51 : vector<1x128xi1>, vector<1x128xf32>
    %53 = arith.addf %47, %52 : vector<1x128xf32>
    %c0_16 = arith.constant 0 : index
    %c0_17 = arith.constant 0 : index
    %54 = vector.load %arg3[%c0_16, %c0_17] : memref<1x128xf32, #tpu.memory_space<vmem>>, vector<1x128xf32>
    tpu.vector_store %arg3[%c0_16, %c0_17], %53 {strides = array<i32>} : memref<1x128xf32, #tpu.memory_space<vmem>>, vector<1x128xf32>,
    return
  }
  func.func @transform_0(%arg0: i32) -> (i32, i32) {
    %c0_i32 = arith.constant 0 : i32
    %c0_i32_0 = arith.constant 0 : i32
    return %c0_i32, %arg0 : i32, i32
  }
  func.func @transform_1(%arg0: i32) -> (i32, i32) {
    %c0_i32 = arith.constant 0 : i32
    %c0_i32_0 = arith.constant 0 : i32
    return %c0_i32, %arg0 : i32, i32
  }
  func.func @transform_2(%arg0: i32) -> (i32, i32) {
    %c0_i32 = arith.constant 0 : i32
    %c0_i32_0 = arith.constant 0 : i32
    return %arg0, %c0_i32 : i32, i32
  }
}

</mosaic_0001>

<bundles_post_ra>
// kernel: tpu_custom_call.1
= control target key start
LH: loop header
LB: loop body
LE: loop exit
PB: predicated region body
PF: predicated region fallthrough
CT: control target
= control target key end

     0   :  { %vm21_vm0 = vcmask 64512   ;;  %vm23_vm1 = vcmask 58368   ;;  %s255_s0 = inlined_call_operand.vmem [shape: f32[10,8], index: 0, kind: input, shape index: {}]   ;;  %s256_s1 = inlined_call_operand.vmem [shape: s32[1,8], index: 1, kind: input, shape index: {}]   ;;  %s257_s2 = inlined_call_operand.hbm [shape: f32[1,128], index: 2, kind: output, shape index: {}]  }
   0x1   :  { %v12_v0 = vld [vmem:[%s255_s0] sm:$0xff]  ;;  %v13_v1 = vld [vmem:[%s255_s0 + $0x8] sm:$0x3] }
   0x2   :  { %v22_v2 = vsel %vm21_vm0, %v12_v0, -inf }
   0x3   :  { %7 = vsyncpa [#allocation3], 0  ;;  %v24_v3 = vsel %vm23_vm1, %v13_v1, -inf  ;;  %v15_v5 = vlaneseq  ;;  %v223_v12 = vld [vmem:[%s256_s1] ss:$0 sm:$0xff]  ;;  %vm103_vm4 = vcmask 57344  }
   0x4   :  { %v25_v4 = vmax.f32 %v22_v2, %v24_v3  ;;  %s190_s14 = smov [#allocation2]   ;;  %s141_s19 = sshll.u32 %s257_s2, 4  ;;  %s142_s19 = int_to_ptr.hbm [resolvable:$true] %s141_s19 }
   0x5   :  { %v215_v8 = vshrl.u32 %v15_v5, 7  ;;  %s139_s15 = sshll.u32 %s190_s14, 4  ;;  %s140_s15 = int_to_ptr.vmem [resolvable:$true] %s139_s15 }
   0x6   :  { %v26_v6 = vrot.slane %v25_v4, 4 }
   0x7   :  { %v218_v11 = vadd.s32 8, %v215_v8  ;;  %vm19_vm2 = vcmp.eq.s32.totalorder %v215_v8, %v223_v12 }
   0x8   :  { %v27_v7 = vmax.f32 %v25_v4, %v26_v6 }
   0x9   :  { %vm20_vm3 = vcmp.eq.s32.totalorder %v218_v11, %v223_v12 }
   0xa   :  { %v28_v9 = vrot.slane %v27_v7, 2 }
   0xc   :  { %v29_v10 = vmax.f32 %v27_v7, %v28_v9 }
   0xe   :  { %v30_v13 = vrot.slane %v29_v10, 1 }
  0x10   :  { %v31_v14 = vmax.f32 %v29_v10, %v30_v13 }
  0x12   :  { %v32_v15 = vsub.f32 %v12_v0, %v31_v14  ;;  %v33_v16 = vsub.f32 %v13_v1, %v31_v14 }
  0x14   :  { %v34_v17 = vmul.f32 1.442695, %v32_v15  ;;  %v36_v18 = vmul.f32 1.442695, %v33_v16  ;;  %v61_v19 = vsel %vm19_vm2, %v32_v15, 0.0  ;;  %v62_v20 = vsel %vm20_vm3, %v33_v16, 0.0 }
  0x15   :  { %v63_v21 = vsel %vm21_vm0, %v61_v19, 0.0  ;;  %v64_v22 = vsel %vm23_vm1, %v62_v20, 0.0 }
  0x16   :  { %156 = vpow2.f32 %v34_v17  ;;  %v65_v23 = vadd.f32 %v64_v22, %v63_v21 }
  0x17   :  { %158 = vpow2.f32 %v36_v18 }
  0x18   :  { %v66_v28 = vrot.slane %v65_v23, 4 }
  0x1a   :  { %v67_v31 = vadd.f32 %v66_v28, %v65_v23 }
  0x1c   :  { %v157_v24 = vpop.eup %156  ;;  %v68_v34 = vrot.slane %v67_v31, 2 }
  0x1d   :  { %v159_v25 = vpop.eup %158  ;;  %v38_v26 = vsel %vm21_vm0, %v157_v24, 0.0 }
  0x1e   :  { %v39_v27 = vsel %vm23_vm1, %v159_v25, 0.0  ;;  %v69_v37 = vadd.f32 %v68_v34, %v67_v31 }
  0x1f   :  { %v40_v29 = vadd.f32 %v39_v27, %v38_v26 }
  0x20   :  { %v70_v39 = vrot.slane %v69_v37, 1 }
  0x21   :  { %v41_v30 = vrot.slane %v40_v29, 4 }
  0x22   :  { %v71_v40 = vadd.f32 %v70_v39, %v69_v37 }
  0x23   :  { %v42_v32 = vadd.f32 %v41_v30, %v40_v29 }
  0x25   :  { %v43_v33 = vrot.slane %v42_v32, 2 }
  0x27   :  { %v44_v35 = vadd.f32 %v43_v33, %v42_v32 }
  0x29   :  { %v45_v36 = vrot.slane %v44_v35, 1 }
  0x2b   :  { %v46_v38 = vadd.f32 %v45_v36, %v44_v35  ;;  %v125_v35 = vand.u32 127, %v15_v5 }
  0x2d   :  { %160 = vlog2.f32 %v46_v38  ;;  %v58_v46 = vand.u32 2147483648, %v46_v38  ;;  %vm52_vm5 = vweird.f32 %v46_v38  ;;  %v56_v48 = vand.u32 2147483647, %v46_v38 }
  0x2e   :  { %162 = vrcp.f32 %v46_v38  ;;  %vm126_vm9 = vcmp.eq.s32.totalorder %v125_v35, 0  ;;  %vm129_vm10 = vcmp.eq.s32.totalorder %v125_v35, 1 }
  0x2f   :  { %v59_v51 = vor.u32 1.1754944e-38, %v58_v46  ;;  %vm57_vm8 = vcmp.eq.f32.partialorder %v56_v48, 8.507059e+37 }
  0x33   :  { %v161_v41 = vpop.eup %160 }
  0x34   :  { %v163_v42 = vpop.eup %162  ;;  %v73_v43 = vmul.f32 0.6931472, %v161_v41 }
  0x35   :  { %v48_v44 = vmul.f32 %v163_v42, %v46_v38  ;;  %vm53_vm6 = vweird.f32 %v163_v42 }
  0x36   :  { %v74_v45 = vsub.f32 %v73_v43, %v71_v40  ;;  %vm54_vm7 = vmor %vm52_vm5, %vm53_vm6 }
  0x37   :  { %v49_v47 = vsub.f32 1.0, %v48_v44 }
  0x38   :  { %v104_v49 = vsel %vm103_vm4, %v74_v45, 0.0 }
  0x39   :  { %105 = vadd.xlane.f32.xlu0 %v104_v49  ;;  %v50_v50 = vmul.f32 %v163_v42, %v49_v47 }
  0x3b   :  { %v51_v52 = vadd.f32 %v163_v42, %v50_v50 }
  0x3d   :  { %v55_v53 = vsel %vm54_vm7, %v163_v42, %v51_v52 }
  0x3e   :  { %v60_v54 = vsel %vm57_vm8, %v59_v51, %v55_v53 }
  0x3f   :  { %v75_v55 = vmul.f32 %v157_v24, %v60_v54  ;;  %v76_v56 = vmul.f32 %v159_v25, %v60_v54 }
  0x41   :  { %v77_v57 = vmax.f32 %v75_v55, 1e-07  ;;  %v78_v58 = vmax.f32 %v76_v56, 1e-07 }
  0x43   :  { %v79_v59 = vmin.f32 %v77_v57, 1.0  ;;  %v80_v60 = vmin.f32 %v78_v58, 1.0 }
  0x45   :  { %v81_v61 = vsel %vm21_vm0, %v79_v59, 0.0  ;;  %v82_v62 = vsel %vm23_vm1, %v80_v60, 0.0  ;;  %v90_v63 = vsel %vm19_vm2, %v79_v59, 0.0  ;;  %v91_v0 = vsel %vm20_vm3, %v80_v60, 0.0 }
  0x46   :  { %v83_v1 = vadd.f32 %v82_v62, %v81_v61  ;;  %v92_v2 = vsel %vm21_vm0, %v90_v63, 0.0  ;;  %v93_v3 = vsel %vm23_vm1, %v91_v0, 0.0 }
  0x47   :  { %v94_v4 = vadd.f32 %v93_v3, %v92_v2 }
  0x48   :  { %v84_v6 = vrot.slane %v83_v1, 4 }
  0x49   :  { %v95_v7 = vrot.slane %v94_v4, 4 }
  0x4a   :  { %v85_v9 = vadd.f32 %v84_v6, %v83_v1 }
  0x4b   :  { %v96_v10 = vadd.f32 %v95_v7, %v94_v4 }
  0x4c   :  { %v86_v13 = vrot.slane %v85_v9, 2 }
  0x4d   :  { %v97_v14 = vrot.slane %v96_v10, 2 }
  0x4e   :  { %v87_v15 = vadd.f32 %v86_v13, %v85_v9 }
  0x4f   :  { %v98_v16 = vadd.f32 %v97_v14, %v96_v10 }
  0x50   :  { %v88_v8 = vrot.slane %v87_v15, 1 }
  0x51   :  { %v99_v17 = vrot.slane %v98_v16, 1 }
  0x52   :  { %v89_v18 = vadd.f32 %v88_v8, %v87_v15 }
  0x53   :  { %v100_v19 = vadd.f32 %v99_v17, %v98_v16 }
  0x55   :  { %v101_v11 = vsub.f32 %v89_v18, %v100_v19 }
  0x57   :  { %v102_v12 = vmul.f32 9.2103405, %v101_v11 }
  0x59   :  { %v114_v20 = vsel %vm103_vm4, %v102_v12, 0.0 }
  0x5a   :  { %115 = vadd.xlane.f32.xlu0 %v114_v20 }
  0xac   :  { %v106_v21 = vpop.xlane.xlu0 %105 }
  0xad   :  { %v107_v22 = vrot.slane %v106_v21, 4 }
  0xaf   :  { %v108_v23 = vadd.f32 %v107_v22, %v106_v21 }
  0xb1   :  { %v109_v24 = vrot.slane %v108_v23, 2 }
  0xb3   :  { %v110_v25 = vadd.f32 %v109_v24, %v108_v23 }
  0xb5   :  { %v111_v26 = vrot.slane %v110_v25, 1 }
  0xb7   :  { %v112_v27 = vadd.f32 %v111_v26, %v110_v25 }
  0xb9   :  { %150 = vpush %v112_v27 }
  0xcd   :  { %v116_v28 = vpop.xlane.xlu0 %115 }
  0xce   :  { %v117_v29 = vrot.slane %v116_v28, 4 }
  0xd0   :  { %v118_v30 = vadd.f32 %v117_v29, %v116_v28 }
  0xd2   :  { %v119_v31 = vrot.slane %v118_v30, 2 }
  0xd4   :  { %v120_v32 = vadd.f32 %v119_v31, %v118_v30 }
  0xd6   :  { %v121_v33 = vrot.slane %v120_v32, 1 }
  0xd8   :  { %v122_v34 = vadd.f32 %v121_v33, %v120_v32 }
  0xda   :  { %152 = vpush %v122_v34 }
  0xea   :  { %s151_s1 = spop %150 }
  0xeb   :  { %v127_v36 = vstv %s151_s1 }
  0xec   :  { %v128_v38 = vsel %vm126_vm9, %v127_v36, 0.0 }
 0x10b   :  { %s153_s16 = spop %152 }
 0x10c   :  { %v130_v37 = vstv %s153_s16 }
 0x10d   :  { %v131_v39 = vsel %vm129_vm10, %v130_v37, 0.0 }
 0x10e   :  { %v132_v40 = vadd.f32 %v131_v39, %v128_v38 }
 0x110   :  { %133 = vst [vmem:[#allocation2] sm:$0x1] %v132_v40 }
 0x111   :  { %144 = dma.vmem_to_hbm [thread:$0]  %s140_s15, 16, %s142_s19, [#allocation3]  }
 0x112   :  { %188 = dma.done.wait [#allocation3], 16  }
 0x113   :  { %189 = vsyncadd [#allocation3], 4294967280 }
 0x114   :  { %149 = vsyncpa [#allocation3], 1 }

</bundles_post_ra>
